<compile_context>
chip_gen: v7x
topology: tpu7x:2x2x1
jax: 0.10.0
libtpu: 0.0.40
codegen_flags: <defaults>
</compile_context>

<pallas_src>
import functools

import jax
import jax.numpy as jnp
from jax.experimental import pallas as pl
from jax.experimental.pallas import tpu as pltpu

LANES = 128
SUBLANES = 8
TR_MAX = 1024     # row tile (multiple of 8); 1024x128 f32 = 512 KiB per input block
NSPLIT_MAX = 2    # leading parallel axis: lets v7x use both TensorCores


def _focal_loss_kernel(p_ref, y_ref, o_ref, *, gamma):
    j = pl.program_id(1)

    @pl.when(j == 0)
    def _():
        o_ref[...] = jnp.zeros_like(o_ref)

    p = p_ref[...].astype(jnp.float32)
    y = y_ref[...].astype(jnp.float32)
    one_m_p = 1.0 - p

    # PyTorch F.binary_cross_entropy clamps the log terms at -100.
    log_p = jnp.maximum(jnp.log(p), -100.0)
    log_1mp = jnp.maximum(jnp.log(one_m_p), -100.0)
    # Negated BCE (the sign flip is folded into the wrapper's alpha/N scale):
    #   y*log_p + (1-y)*log_1mp == log_1mp + y*(log_p - log_1mp)
    neg_bce = log_1mp + y * (log_p - log_1mp)

    # Focal weight (1 - p)**gamma:
    #   integer gamma -> repeated multiply (pure VPU, e.g. one mul for gamma=2)
    #   otherwise     -> exp(gamma * log(1-p)) reusing the clamped log (1 EUP op)
    if float(gamma).is_integer() and 0 <= gamma <= 16:
        g = int(gamma)
        if g == 0:
            weight = None
        else:
            weight = one_m_p
            for _ in range(g - 1):
                weight = weight * one_m_p
    else:
        weight = jnp.exp(jnp.float32(gamma) * log_1mp)

    loss = neg_bce if weight is None else weight * neg_bce

    # Partial-sum into the resident (8, 128) output block: only vreg-to-vreg
    # VPU adds per grid step; the cross-lane/sublane reduce is done once in
    # the wrapper. The reshape only splits the leading dim, so it is layout-free.
    tr = loss.shape[0]
    partial = loss.reshape(tr // SUBLANES, SUBLANES, LANES).sum(axis=0)
    o_ref[...] += partial


def focal_loss_pallas(pred, label, alpha: float = 0.25, gamma: float = 2):
    assert pred.shape == label.shape
    n_elem = pred.size

    rows = -(-n_elem // LANES)
    nsplit = NSPLIT_MAX if rows >= NSPLIT_MAX * TR_MAX else 1
    tr = min(TR_MAX, SUBLANES * (-(-rows // SUBLANES)))
    rows_per_step = nsplit * tr
    padded_rows = rows_per_step * (-(-rows // rows_per_step))
    inner = padded_rows // rows_per_step      # reduction steps per split
    pad = padded_rows * LANES - n_elem

    p_flat = pred.reshape(-1)
    y_flat = label.reshape(-1)
    if pad:
        # Padding with pred=1, label=1 contributes exactly 0 loss for any
        # gamma >= 0: neg_bce = 1*log(1) + 0*max(log(0), -100) = 0 and the
        # focal weight stays finite, so no mask stream is needed.
        p_flat = jnp.pad(p_flat, (0, pad), constant_values=1.0)
        y_flat = jnp.pad(y_flat, (0, pad), constant_values=1.0)
    p2 = p_flat.reshape(padded_rows, LANES)
    y2 = y_flat.reshape(padded_rows, LANES)

    kernel = functools.partial(_focal_loss_kernel, gamma=gamma)

    partials = pl.pallas_call(
        kernel,
        out_shape=jax.ShapeDtypeStruct((nsplit * SUBLANES, LANES), jnp.float32),
        grid_spec=pltpu.PrefetchScalarGridSpec(
            num_scalar_prefetch=0,
            grid=(nsplit, inner),
            in_specs=[
                pl.BlockSpec((tr, LANES), lambda c, j: (c * inner + j, 0)),
                pl.BlockSpec((tr, LANES), lambda c, j: (c * inner + j, 0)),
            ],
            out_specs=pl.BlockSpec((SUBLANES, LANES), lambda c, j: (c, 0)),
        ),
        compiler_params=pltpu.CompilerParams(
            # Leading axis parallel (v7x megacore split); reduction axis last.
            dimension_semantics=("parallel", "arbitrary"),
            vmem_limit_bytes=64 << 20,
        ),
    )(p2, y2)

    # Final cross-lane reduce + sign flip + alpha/N scaling: tiny XLA epilogue.
    return (-jnp.float32(alpha) / jnp.float32(n_elem)) * jnp.sum(partials)


def focal_loss_ref(pred, label, alpha=0.25, gamma=2):
    p = pred.astype(jnp.float32)
    y = label.astype(jnp.float32)
    log_p = jnp.maximum(jnp.log(p), -100.0)
    log_1mp = jnp.maximum(jnp.log(1.0 - p), -100.0)
    bce = -(y * log_p + (1.0 - y) * log_1mp)
    w = (1.0 - p) ** gamma
    return alpha * jnp.mean(w * bce)


if __name__ == "__main__":
    key = jax.random.PRNGKey(0)
    k1, k2 = jax.random.split(key)
    # NCHW inputs, small shapes: batch=2, channels=4, spatial=16x16.
    pred = jax.random.uniform(k1, (2, 4, 16, 16), jnp.float32, 1e-4, 1.0 - 1e-4)
    label = (jax.random.uniform(k2, (2, 4, 16, 16), jnp.float32) > 0.5).astype(jnp.float32)

    out = focal_loss_pallas(pred, label, alpha=0.25, gamma=2)
    out = jax.block_until_ready(out)

    ref = focal_loss_ref(pred, label, alpha=0.25, gamma=2)
    assert jnp.allclose(out, ref, rtol=1e-5, atol=1e-6), (out, ref)
    print("KERNEL_OK")
</pallas_src>

<mosaic_0001>
module attributes {stable_mosaic.version = 11 : i64} {
  func.func @_focal_loss_kernel(%arg0: i32, %arg1: i32, %arg2: memref<16x128xf32, #tpu.memory_space<vmem>>, %arg3: memref<16x128xf32, #tpu.memory_space<vmem>>, %arg4: memref<8x128xf32, #tpu.memory_space<vmem>>) attributes {dimension_semantics = [#tpu.dimension_semantics<parallel>, #tpu.dimension_semantics<arbitrary>], iteration_bounds = array<i64: 1, 1>, scalar_prefetch = 0 : i64, scratch_operands = 0 : i64, tpu.core_type = #tpu.core_type<tc>, window_params = [{transform_indices = @transform_0, window_bounds = array<i64: 16, 128>}, {transform_indices = @transform_1, window_bounds = array<i64: 16, 128>}, {transform_indices = @transform_2, window_bounds = array<i64: 8, 128>}]} {
    %c0_i32 = arith.constant 0 : i32
    %0 = arith.cmpi eq, %arg1, %c0_i32 : i32
    %1 = arith.extui %0 : i1 to i32
    %c0_i32_0 = arith.constant 0 : i32
    %2 = arith.cmpi ne, %1, %c0_i32_0 : i32
    scf.if %2 {
      %cst_11 = arith.constant 0.000000e+00 : f32
      %23 = vector.broadcast %cst_11 : f32 to vector<8x128xf32>
      %c0_12 = arith.constant 0 : index
      %c0_13 = arith.constant 0 : index
      %24 = vector.load %arg4[%c0_12, %c0_13] : memref<8x128xf32, #tpu.memory_space<vmem>>, vector<8x128xf32>
      tpu.vector_store %arg4[%c0_12, %c0_13], %23 {strides = array<i32>} : memref<8x128xf32, #tpu.memory_space<vmem>>, vector<8x128xf32>,
    } else {
    }
    %c0 = arith.constant 0 : index
    %c0_1 = arith.constant 0 : index
    %3 = vector.load %arg2[%c0, %c0_1] : memref<16x128xf32, #tpu.memory_space<vmem>>, vector<16x128xf32>
    %c0_2 = arith.constant 0 : index
    %c0_3 = arith.constant 0 : index
    %4 = vector.load %arg3[%c0_2, %c0_3] : memref<16x128xf32, #tpu.memory_space<vmem>>, vector<16x128xf32>
    %cst = arith.constant 1.000000e+00 : f32
    %5 = vector.broadcast %cst : f32 to vector<16x128xf32>
    %6 = arith.subf %5, %3 : vector<16x128xf32>
    %7 = math.log %3 : vector<16x128xf32>
    %cst_4 = arith.constant -1.000000e+02 : f32
    %8 = vector.broadcast %cst_4 : f32 to vector<16x128xf32>
    %9 = arith.maximumf %7, %8 : vector<16x128xf32>
    %10 = math.log %6 : vector<16x128xf32>
    %cst_5 = arith.constant -1.000000e+02 : f32
    %11 = vector.broadcast %cst_5 : f32 to vector<16x128xf32>
    %12 = arith.maximumf %10, %11 : vector<16x128xf32>
    %13 = arith.subf %9, %12 : vector<16x128xf32>
    %14 = arith.mulf %4, %13 : vector<16x128xf32>
    %15 = arith.addf %12, %14 : vector<16x128xf32>
    %16 = arith.mulf %6, %6 : vector<16x128xf32>
    %17 = arith.mulf %16, %15 : vector<16x128xf32>
    %18 = vector.shape_cast %17 : vector<16x128xf32> to vector<2x8x128xf32>
    %cst_6 = arith.constant dense<0.000000e+00> : vector<8x128xf32>
    %19 = vector.multi_reduction <add>, %18, %cst_6 [0] : vector<2x8x128xf32> to vector<8x128xf32>
    %c0_7 = arith.constant 0 : index
    %c0_8 = arith.constant 0 : index
    %20 = vector.load %arg4[%c0_7, %c0_8] : memref<8x128xf32, #tpu.memory_space<vmem>>, vector<8x128xf32>
    %21 = arith.addf %20, %19 : vector<8x128xf32>
    %c0_9 = arith.constant 0 : index
    %c0_10 = arith.constant 0 : index
    %22 = vector.load %arg4[%c0_9, %c0_10] : memref<8x128xf32, #tpu.memory_space<vmem>>, vector<8x128xf32>
    tpu.vector_store %arg4[%c0_9, %c0_10], %21 {strides = array<i32>} : memref<8x128xf32, #tpu.memory_space<vmem>>, vector<8x128xf32>,
    return
  }
  func.func @transform_0(%arg0: i32, %arg1: i32) -> (i32, i32) {
    %c1_i32 = arith.constant 1 : i32
    %0 = arith.muli %arg0, %c1_i32 : i32
    %1 = arith.addi %0, %arg1 : i32
    %c0_i32 = arith.constant 0 : i32
    %c0_i32_0 = arith.constant 0 : i32
    return %1, %c0_i32 : i32, i32
  }
  func.func @transform_1(%arg0: i32, %arg1: i32) -> (i32, i32) {
    %c1_i32 = arith.constant 1 : i32
    %0 = arith.muli %arg0, %c1_i32 : i32
    %1 = arith.addi %0, %arg1 : i32
    %c0_i32 = arith.constant 0 : i32
    %c0_i32_0 = arith.constant 0 : i32
    return %1, %c0_i32 : i32, i32
  }
  func.func @transform_2(%arg0: i32, %arg1: i32) -> (i32, i32) {
    %c0_i32 = arith.constant 0 : i32
    %c0_i32_0 = arith.constant 0 : i32
    return %arg0, %c0_i32 : i32, i32
  }
}

</mosaic_0001>

<bundles_post_ra>
// kernel: tpu_custom_call.1
= control target key start
LH: loop header
LB: loop body
LE: loop exit
PB: predicated region body
PF: predicated region fallthrough
CT: control target
= control target key end

     0   :  { %7 = vsyncpa [#allocation3], 0  ;;  %s247_s0 = inlined_call_operand.hbm [shape: f32[16,128], index: 0, kind: input, shape index: {}]   ;;  %s248_s1 = inlined_call_operand.hbm [shape: f32[16,128], index: 1, kind: input, shape index: {}]   ;;  %s249_s2 = inlined_call_operand.hbm [shape: f32[8,128], index: 2, kind: output, shape index: {}]  }
   0x1   :  { %8 = vsyncpa [#allocation6], 0 }
   0x2   :  { %9 = vsyncpa [#allocation4], 0  ;;  %s191_s9 = smov [#allocation2]   ;;  %s119_s13 = scalar_lea.hbm %s247_s0, 256 }
   0x3   :  { %s19_s10 = sshll.u32 %s191_s9, 4  ;;  %p120_p0 = scmp.ne.s32.totalorder %s247_s0, %s119_s13  ;;  %s20_s10 = int_to_ptr.vmem [resolvable:$true] %s19_s10 }
   0x4   :  { %p123_p1 = scmp.lt.u32.totalorder %s119_s13, %s247_s0 }
   0x6   :  { %p125_p2 = pnand %p123_p1, %p120_p0 }
   0x8   :  { %128 = shalt.err (!%p125_p2)
}
   0x9   :  { %s129_s18 = scalar_lea.vmem %s20_s10, 256  ;;  %p134_p4 = scmp.lt.s32.totalorder %s20_s10, %s20_s10 }
   0xa   :  { %p130_p3 = scmp.ne.s32.totalorder %s20_s10, %s129_s18  ;;  %p135_p5 = scmp.lt.s32.totalorder %s129_s18, %s129_s18 }
   0xc   :  { %p136_p6 = por %p135_p5, %p134_p4 }
   0xe   :  { %p137_p7 = pnand %p136_p6, %p130_p3 }
  0x10   :  { %140 = shalt.err (!%p137_p7)
}
  0x11   :  { %s192_s19 = smov 128   ;;  %s193_s20 = smov 8  }
  0x12   :  { %25 = dma.hbm_to_vmem [thread:$0]  %s247_s0, 256, %s20_s10, [#allocation3], %s192_s19, %s192_s19, %s193_s20  }
  0x13   :  { %s194_s23 = smov [#allocation5]   ;;  %s141_s27 = scalar_lea.hbm %s248_s1, 256 }
  0x14   :  { %s35_s24 = sshll.u32 %s194_s23, 4  ;;  %p142_p8 = scmp.ne.s32.totalorder %s248_s1, %s141_s27  ;;  %s36_s24 = int_to_ptr.vmem [resolvable:$true] %s35_s24 }
  0x15   :  { %p145_p9 = scmp.lt.u32.totalorder %s141_s27, %s248_s1 }
  0x17   :  { %p147_p10 = pnand %p145_p9, %p142_p8 }
  0x19   :  { %150 = shalt.err (!%p147_p10)
}
  0x1a   :  { %s151_s4 = scalar_lea.vmem %s36_s24, 256  ;;  %p156_p12 = scmp.lt.s32.totalorder %s36_s24, %s36_s24 }
  0x1b   :  { %p152_p11 = scmp.ne.s32.totalorder %s36_s24, %s151_s4  ;;  %p157_p13 = scmp.lt.s32.totalorder %s151_s4, %s151_s4 }
  0x1d   :  { %p158_p0 = por %p157_p13, %p156_p12 }
  0x1f   :  { %p159_p1 = pnand %p158_p0, %p152_p11 }
  0x21   :  { %162 = shalt.err (!%p159_p1)
}
  0x22   :  { %41 = dma.hbm_to_vmem [thread:$0]  %s248_s1, 256, %s36_s24, [#allocation6], %s192_s19, %s192_s19, %s193_s20  }
  0x23   :  { %185 = dma.done.wait [#allocation3], 256  }
  0x24   :  { %186 = vsyncadd [#allocation3], 4294967040 }
  0x25   :  { %187 = dma.done.wait [#allocation6], 256  }
  0x26   :  { %188 = vsyncadd [#allocation6], 4294967040  ;;  %v57_v0 = vld [vmem:[#allocation2] sm:$0xff]  ;;  %v58_v1 = vld [vmem:[#allocation2 + $0x8] sm:$0xff]  ;;  %s195_s1 = smov [#allocation7]  }
  0x27   :  { %v61_v2 = vsub.f32 1.0, %v57_v0  ;;  %v62_v3 = vsub.f32 1.0, %v58_v1  ;;  %111 = vlog2.f32 %v57_v0  ;;  %v59_v15 = vld [vmem:[#allocation5] sm:$0xff]  ;;  %v60_v17 = vld [vmem:[#allocation5 + $0x8] sm:$0xff]  ;;  %s95_s6 = sshll.u32 %s195_s1, 4  ;;  %s96_s6 = int_to_ptr.vmem [resolvable:$true] %s95_s6 }
  0x28   :  { %113 = vlog2.f32 %v58_v1  ;;  %s163_s7 = scalar_lea.vmem %s96_s6, 128  ;;  %p168_p3 = scmp.lt.s32.totalorder %s96_s6, %s96_s6 }
  0x29   :  { %115 = vlog2.f32 %v61_v2  ;;  %v81_v21 = vmul.f32 %v61_v2, %v61_v2  ;;  %v82_v23 = vmul.f32 %v62_v3, %v62_v3  ;;  %p164_p2 = scmp.ne.s32.totalorder %s96_s6, %s163_s7  ;;  %p169_p4 = scmp.lt.s32.totalorder %s163_s7, %s163_s7 }
  0x2a   :  { %117 = vlog2.f32 %v62_v3 }
  0x2b   :  { %p170_p5 = por %p169_p4, %p168_p3 }
  0x2d   :  { %p171_p6 = pnand %p170_p5, %p164_p2 }
  0x31   :  { %v112_v4 = vpop.eup %111 }
  0x32   :  { %v114_v5 = vpop.eup %113  ;;  %v64_v6 = vmul.f32 0.6931472, %v112_v4 }
  0x33   :  { %v116_v7 = vpop.eup %115  ;;  %v66_v8 = vmul.f32 0.6931472, %v114_v5 }
  0x34   :  { %v118_v9 = vpop.eup %117  ;;  %v67_v10 = vmax.f32 %v64_v6, -100.0  ;;  %v70_v11 = vmul.f32 0.6931472, %v116_v7 }
  0x35   :  { %v68_v12 = vmax.f32 %v66_v8, -100.0  ;;  %v72_v13 = vmul.f32 0.6931472, %v118_v9 }
  0x36   :  { %v73_v14 = vmax.f32 %v70_v11, -100.0 }
  0x37   :  { %v74_v16 = vmax.f32 %v72_v13, -100.0 }
  0x38   :  { %v75_v18 = vsub.f32 %v67_v10, %v73_v14 }
  0x39   :  { %v76_v19 = vsub.f32 %v68_v12, %v74_v16 }
  0x3a   :  { %v77_v20 = vmul.f32 %v75_v18, %v59_v15 }
  0x3b   :  { %v78_v22 = vmul.f32 %v76_v19, %v60_v17 }
  0x3c   :  { %v79_v24 = vadd.f32 %v77_v20, %v73_v14 }
  0x3d   :  { %v80_v25 = vadd.f32 %v78_v22, %v74_v16 }
  0x3e   :  { %v83_v26 = vmul.f32 %v81_v21, %v79_v24 }
  0x3f   :  { %v84_v27 = vmul.f32 %v82_v23, %v80_v25 }
  0x41   :  { %v85_v28 = vadd.f32 %v84_v27, %v83_v26 }
  0x43   :  { %88 = vst [vmem:[#allocation7] sm:$0xff] %v85_v28 }
  0x44   :  { %174 = shalt.err (!%p171_p6)
}
  0x45   :  { %s175_s10 = scalar_lea.hbm %s249_s2, 128 }
  0x46   :  { %p176_p7 = scmp.ne.s32.totalorder %s249_s2, %s175_s10  ;;  %p179_p8 = scmp.lt.u32.totalorder %s175_s10, %s249_s2 }
  0x48   :  { %p181_p9 = pnand %p179_p8, %p176_p7 }
  0x4a   :  { %184 = shalt.err (!%p181_p9)
}
  0x4b   :  { %98 = dma.vmem_to_hbm [thread:$0]  %s96_s6, 128, %s249_s2, [#allocation4]  }
  0x4c   :  { %189 = dma.done.wait [#allocation4], 128  }
  0x4d   :  { %190 = vsyncadd [#allocation4], 4294967168 }
  0x4e   :  { %102 = vsyncpa [#allocation3], 1 }
  0x4f   :  { %103 = vsyncpa [#allocation6], 1 }
  0x50   :  { %104 = vsyncpa [#allocation4], 1 }

</bundles_post_ra>
